<compile_context>
chip_gen: v5e
topology: v5e:2x2
jax: 0.10.0
libtpu: 0.0.40
codegen_flags: <defaults>
</compile_context>

<pallas_src>
import functools

import numpy as np
import jax
import jax.numpy as jnp
from jax.experimental import pallas as pl
from jax.experimental.pallas import tpu as pltpu


def _round_up(x, m):
    return ((x + m - 1) // m) * m


def _vmem_defaults():
    try:
        phys = int(pltpu.get_tpu_info().vmem_capacity_bytes)
    except Exception:
        phys = 0
    if phys >= 100 * 1024 * 1024:         # v5e/v6e: 128 MiB physical
        return 64 * 1024 * 1024, 20 * 1024 * 1024
    # v7x (64 MiB physical) or unknown: conservative (largest kernel needs ~18 MiB).
    return 32 * 1024 * 1024, 12 * 1024 * 1024


VMEM_LIMIT_BYTES, SINGLE_STEP_BYTES = _vmem_defaults()
_ACC_REG_BYTES = 128 * 1024               # keep per-tile f32 accumulator in vregs


# ----------------------------------------------------------------------------
# Pallas kernels
# ----------------------------------------------------------------------------

def _mm_bn_relu_kernel(x_ref, w_ref, s_ref, b_ref, o_ref):
    """relu((X @ W) * scale + bias); full K reduction in one step."""
    acc = jnp.dot(x_ref[...], w_ref[...], preferred_element_type=jnp.float32)
    y = acc * s_ref[...] + b_ref[...]
    o_ref[...] = jnp.maximum(y, 0.0).astype(o_ref.dtype)


def _conv_taps_kernel(x_ref, w_ref, s_ref, b_ref, o_ref, *, tap_offsets, tm):
    """Stride-1 conv as kh*kw shifted-row dots over a resident flattened map.

    x_ref: (alloc_rows, Cin) whole padded map (flat), resident across M tiles.
    w_ref: (kh*kw, Cin, Cout).  o_ref: (tm, Cout) tile of the flat output.
    """
    m0 = pl.program_id(1) * tm
    cout = o_ref.shape[-1]
    acc = jnp.zeros((tm, cout), jnp.float32)
    for t, off in enumerate(tap_offsets):
        xt = x_ref[pl.ds(m0 + off, tm), :]
        acc = acc + jnp.dot(xt, w_ref[t], preferred_element_type=jnp.float32)
    y = acc * s_ref[...] + b_ref[...]
    o_ref[...] = jnp.maximum(y, 0.0).astype(o_ref.dtype)


def _pool_dense_kernel(x_ref, o_ref, *, kh, kw, op):
    """Stride-1 pooling (separable row/col taps) over a (Hp, Wp, Cblk) block."""
    ho, wo, _ = o_ref.shape
    x = x_ref[...]
    if op == "avg":
        x = x.astype(jnp.float32)
    t = x[:, 0:wo, :]
    for dj in range(1, kw):
        seg = x[:, dj:dj + wo, :]
        t = t + seg if op == "avg" else jnp.maximum(t, seg)
    r = t[0:ho, :, :]
    for di in range(1, kh):
        seg = t[di:di + ho, :, :]
        r = r + seg if op == "avg" else jnp.maximum(r, seg)
    if op == "avg":
        r = r * (1.0 / (kh * kw))
    o_ref[...] = r.astype(o_ref.dtype)


def _global_pool_kernel(x_ref, o_ref, *, op):
    """Window covers the whole map (final MaxPool2d(8) on the 8x8 map)."""
    x = x_ref[...]
    if op == "max":
        o_ref[...] = jnp.max(x, axis=(0, 1), keepdims=True).astype(o_ref.dtype)
    else:
        o_ref[...] = jnp.mean(x.astype(jnp.float32), axis=(0, 1),
                              keepdims=True).astype(o_ref.dtype)


# ----------------------------------------------------------------------------
# Fused matmul + BN + ReLU (1x1 convs, fused branch heads, strided-conv im2col)
# ----------------------------------------------------------------------------

def _mm_call(x, w, s2, b2, out_dtype):
    M, K = x.shape
    C = w.shape[1]
    if M <= 512:
        ntiles, tm = 1, M
    else:
        ntiles = max(2, -(-M // 512))
        tm = _round_up(-(-M // ntiles), 8)
    m_pad = ntiles * tm
    if m_pad != M:
        # TODO(synk): ragged last tile instead of padding would save one copy.
        x = jnp.pad(x, ((0, m_pad - M), (0, 0)))
    out = pl.pallas_call(
        _mm_bn_relu_kernel,
        out_shape=jax.ShapeDtypeStruct((m_pad, C), out_dtype),
        grid_spec=pltpu.PrefetchScalarGridSpec(
            num_scalar_prefetch=0,
            grid=(ntiles,),
            in_specs=[
                pl.BlockSpec((tm, K), lambda i: (i, 0)),
                pl.BlockSpec((K, C), lambda i: (0, 0)),
                pl.BlockSpec((1, C), lambda i: (0, 0)),
                pl.BlockSpec((1, C), lambda i: (0, 0)),
            ],
            out_specs=pl.BlockSpec((tm, C), lambda i: (i, 0)),
        ),
        compiler_params=pltpu.CompilerParams(
            dimension_semantics=("parallel",),
            vmem_limit_bytes=VMEM_LIMIT_BYTES),
    )(x, w, s2, b2)
    if m_pad != M:
        out = out[:M]
    return out


def _matmul_bn_relu(x, w, scale, bias, out_dtype):
    """x: [M, K] bf16, w: [K, C] bf16, scale/bias: [C] f32 -> [M, C]."""
    M, K = x.shape
    C = w.shape[1]
    s2 = scale.astype(jnp.float32).reshape(1, C)
    b2 = bias.astype(jnp.float32).reshape(1, C)
    tm_eff = M if M <= 512 else 512
    bytes_single = (tm_eff * K + K * C + 2 * tm_eff * C) * 2
    if bytes_single <= SINGLE_STEP_BYTES:
        return _mm_call(x, w, s2, b2, out_dtype)
    # Oversized weights: split output channels (full-K per chunk) — keeps the
    # no-accumulator epilogue and lane-dense stores.  Unused in this network.
    nchunks = max(2, int(np.ceil(bytes_single / SINGLE_STEP_BYTES)))
    nchunks = min(nchunks, C)
    bounds = [int(b) for b in np.linspace(0, C, nchunks + 1)]
    outs = []
    for a, b in zip(bounds[:-1], bounds[1:]):
        if b > a:
            outs.append(_mm_call(x, w[:, a:b], s2[:, a:b], b2[:, a:b], out_dtype))
    return jnp.concatenate(outs, axis=-1)


# ----------------------------------------------------------------------------
# Stride-1 spatial conv without HBM im2col (in-kernel shifted-row taps)
# ----------------------------------------------------------------------------

def _conv_stride1_taps(xp, w, scale, bias, out_dtype):
    """xp: already zero-padded NHWC bf16; w: [kh, kw, Cin, Cout]; stride 1."""
    N, Hp, Wp, Cin = xp.shape
    kh, kw, _, Cout = w.shape
    Ho, Wo = Hp - kh + 1, Wp - kw + 1
    m_out = Ho * Wp                       # flat rows incl. (Wp - Wo) junk columns

    tm_budget = max(128, (_ACC_REG_BYTES // (Cout * 4)) // 8 * 8)
    ntiles = max(1, -(-m_out // tm_budget))
    if m_out >= 1024:
        ntiles = max(ntiles, 2)           # v7x: feed both TensorCores
    tm = _round_up(-(-m_out // ntiles), 8)
    m_pad = ntiles * tm

    max_off = (kh - 1) * Wp + (kw - 1)
    alloc = m_pad + max_off
    x_flat = xp.reshape(N, Hp * Wp, Cin)
    if alloc > Hp * Wp:
        x_flat = jnp.pad(x_flat, ((0, 0), (0, alloc - Hp * Wp), (0, 0)))

    w_taps = w.reshape(kh * kw, Cin, Cout)
    s2 = scale.astype(jnp.float32).reshape(1, Cout)
    b2 = bias.astype(jnp.float32).reshape(1, Cout)
    offsets = tuple(di * Wp + dj for di in range(kh) for dj in range(kw))
    kernel = functools.partial(_conv_taps_kernel, tap_offsets=offsets, tm=tm)

    out = pl.pallas_call(
        kernel,
        out_shape=jax.ShapeDtypeStruct((N, m_pad, Cout), out_dtype),
        grid_spec=pltpu.PrefetchScalarGridSpec(
            num_scalar_prefetch=0,
            grid=(N, ntiles),
            in_specs=[
                pl.BlockSpec((None, alloc, Cin), lambda n, m: (n, 0, 0)),
                pl.BlockSpec((kh * kw, Cin, Cout), lambda n, m: (0, 0, 0)),
                pl.BlockSpec((1, Cout), lambda n, m: (0, 0)),
                pl.BlockSpec((1, Cout), lambda n, m: (0, 0)),
            ],
            out_specs=pl.BlockSpec((None, tm, Cout), lambda n, m: (n, m, 0)),
        ),
        compiler_params=pltpu.CompilerParams(
            dimension_semantics=("parallel", "parallel"),
            vmem_limit_bytes=VMEM_LIMIT_BYTES),
    )(x_flat, w_taps, s2, b2)

    out = out[:, :m_out, :].reshape(N, Ho, Wp, Cout)
    if Wo != Wp:
        out = out[:, :, :Wo, :]
    return out


# ----------------------------------------------------------------------------
# Conv / pool wrappers
# ----------------------------------------------------------------------------

@functools.partial(jax.jit, static_argnames=("stride", "padding", "out_dtype"))
def conv_bn_relu(x, w, scale, bias, *, stride=(1, 1), padding=(0, 0),
                 out_dtype=jnp.bfloat16):
    """x: [N, H, W, Cin] NHWC bf16; w: [kh, kw, Cin, Cout] bf16."""
    N, H, W, Cin = x.shape
    kh, kw, _, Cout = w.shape
    sh, sw = stride
    ph, pw = padding
    if kh == 1 and kw == 1 and sh == 1 and sw == 1:
        y = _matmul_bn_relu(x.reshape(N * H * W, Cin), w.reshape(Cin, Cout),
                            scale, bias, out_dtype)
        return y.reshape(N, H, W, Cout)
    xp = jnp.pad(x, ((0, 0), (ph, ph), (pw, pw), (0, 0)))
    if sh == 1 and sw == 1:
        return _conv_stride1_taps(xp, w, scale, bias, out_dtype)
    # Stride-2 convs (5 in the network): XLA im2col + fused matmul.
    # TODO(synk): strided in-kernel taps would drop the small patch matrices too.
    Hp, Wp = H + 2 * ph, W + 2 * pw
    Ho = (Hp - kh) // sh + 1
    Wo = (Wp - kw) // sw + 1
    cols = []
    for di in range(kh):
        for dj in range(kw):
            cols.append(xp[:, di:di + (Ho - 1) * sh + 1:sh,
                           dj:dj + (Wo - 1) * sw + 1:sw, :])
    patches = jnp.concatenate(cols, axis=-1)
    pm = patches.reshape(N * Ho * Wo, kh * kw * Cin)
    wm = w.reshape(kh * kw * Cin, Cout)
    y = _matmul_bn_relu(pm, wm, scale, bias, out_dtype)
    return y.reshape(N, Ho, Wo, Cout)


def _pool_c_tile(c):
    if c % 256 == 0:
        return 256
    if c % 128 == 0:
        return 128
    return c


def _pool_call(kernel, xp, out_hw):
    N, Hp, Wp, C = xp.shape
    Ho, Wo = out_hw
    tc = _pool_c_tile(C)
    return pl.pallas_call(
        kernel,
        out_shape=jax.ShapeDtypeStruct((N, Ho, Wo, C), xp.dtype),
        grid_spec=pltpu.PrefetchScalarGridSpec(
            num_scalar_prefetch=0,
            grid=(N, C // tc),
            in_specs=[pl.BlockSpec((None, Hp, Wp, tc), lambda n, c: (n, 0, 0, c))],
            out_specs=pl.BlockSpec((None, Ho, Wo, tc), lambda n, c: (n, 0, 0, c)),
        ),
        compiler_params=pltpu.CompilerParams(
            dimension_semantics=("parallel", "parallel"),
            vmem_limit_bytes=VMEM_LIMIT_BYTES),
    )(xp)


@functools.partial(jax.jit, static_argnames=("ksize", "stride", "padding", "op"))
def pool2d(x, *, ksize, stride, padding=(0, 0), op="max"):
    """x: [N, H, W, C] NHWC.  op in {"max", "avg"} (avg: count_include_pad)."""
    N, H, W, C = x.shape
    kh, kw = ksize
    sh, sw = stride
    ph, pw = padding
    xp = jnp.pad(x, ((0, 0), (ph, ph), (pw, pw), (0, 0)))
    Hp, Wp = H + 2 * ph, W + 2 * pw
    if kh == Hp and kw == Wp:
        return _pool_call(functools.partial(_global_pool_kernel, op=op), xp, (1, 1))
    # TODO(synk): stride-2 max pools still compute the dense map then subsample
    # in XLA; direct strided output would need strided sublane loads in-kernel.
    y = _pool_call(functools.partial(_pool_dense_kernel, kh=kh, kw=kw, op=op),
                   xp, (Hp - kh + 1, Wp - kw + 1))
    if sh != 1 or sw != 1:
        y = y[:, ::sh, ::sw, :]
    return y


# ----------------------------------------------------------------------------
# Deterministic synthetic parameters (mirrors module __init__ shapes)
# ----------------------------------------------------------------------------

class ParamGen:
    def __init__(self, seed=0):
        self.key = jax.random.PRNGKey(seed)
        self.count = 0

    def _next(self):
        self.count += 1
        return jax.random.fold_in(self.key, self.count)

    def cbr(self, cin, cout, ksize, stride=1, padding=0):
        if isinstance(ksize, int):
            ksize = (ksize, ksize)
        if isinstance(stride, int):
            stride = (stride, stride)
        if isinstance(padding, int):
            padding = (padding, padding)
        kh, kw = ksize
        fan_in = cin * kh * kw
        w = jax.random.normal(self._next(), (kh, kw, cin, cout),
                              jnp.float32) * np.sqrt(2.0 / fan_in)
        conv_b = jax.random.uniform(self._next(), (cout,), jnp.float32,
                                    -1.0 / np.sqrt(fan_in), 1.0 / np.sqrt(fan_in))
        gamma = jnp.ones((cout,), jnp.float32)
        beta = jnp.zeros((cout,), jnp.float32)
        run_mean = jnp.zeros((cout,), jnp.float32)
        run_var = jnp.ones((cout,), jnp.float32)
        eps = 1e-5
        scale = gamma / jnp.sqrt(run_var + eps)
        bias = beta + (conv_b - run_mean) * scale
        return dict(w=w.astype(jnp.bfloat16), scale=scale, bias=bias,
                    stride=tuple(stride), padding=tuple(padding))


def _fuse_1x1(heads):
    """Fuse parallel 1x1 heads (same input) into one lane-dense matmul."""
    w = jnp.concatenate([h["w"] for h in heads], axis=-1)
    scale = jnp.concatenate([h["scale"] for h in heads], axis=0)
    bias = jnp.concatenate([h["bias"] for h in heads], axis=0)
    sizes = [int(h["w"].shape[-1]) for h in heads]
    splits = tuple(int(s) for s in np.cumsum(sizes)[:-1])
    return dict(w=w, scale=scale, bias=bias, stride=heads[0]["stride"],
                padding=heads[0]["padding"], splits=splits)


def apply_cbr(p, x, out_dtype=jnp.bfloat16):
    return conv_bn_relu(x, p["w"], p["scale"], p["bias"],
                        stride=p["stride"], padding=p["padding"],
                        out_dtype=out_dtype)


def seq(ps, x):
    for p in ps:
        x = apply_cbr(p, x)
    return x


def _split_channels(x, splits):
    return jnp.split(x, list(splits), axis=-1)


# ----------------------------------------------------------------------------
# Inception modules (1x1 heads fused; concat order matches the torch module)
# ----------------------------------------------------------------------------

def make_block1(pg, cin, pool_ch):
    b1 = pg.cbr(cin, 64, 1)
    b2_head = pg.cbr(cin, 48, 1)
    b3_head = pg.cbr(cin, 64, 1)
    return dict(
        head=_fuse_1x1([b1, b2_head, b3_head]),
        b2_tail=[pg.cbr(48, 64, 5, padding=2)],
        b3_tail=[pg.cbr(64, 96, 3, padding=1), pg.cbr(96, 96, 3, padding=1)],
        b4=[pg.cbr(cin, pool_ch, 1)],
    )


def block1_forward(p, x):
    # TODO(synk): branch outputs could be written straight into their channel
    # slice of the module output (input_output_aliases) to drop this concat.
    h = apply_cbr(p["head"], x)
    b1, b2, b3 = _split_channels(h, p["head"]["splits"])
    b2 = seq(p["b2_tail"], b2)
    b3 = seq(p["b3_tail"], b3)
    b4 = pool2d(x, ksize=(3, 3), stride=(1, 1), padding=(1, 1), op="avg")
    b4 = seq(p["b4"], b4)
    return jnp.concatenate([b1, b2, b3, b4], axis=-1)


def make_block2a(pg, cin):
    return dict(
        b1=[pg.cbr(cin, 384, 3, stride=2)],
        b2=[pg.cbr(cin, 64, 1), pg.cbr(64, 96, 3, padding=1),
            pg.cbr(96, 96, 3, stride=2)],
    )


def block2a_forward(p, x):
    b1 = seq(p["b1"], x)
    b2 = seq(p["b2"], x)
    b3 = pool2d(x, ksize=(3, 3), stride=(2, 2), op="max")
    return jnp.concatenate([b1, b2, b3], axis=-1)


def make_block2b(pg, cin, mid):
    b1 = pg.cbr(cin, 192, 1)
    b2_head = pg.cbr(cin, mid, 1)
    b3_head = pg.cbr(cin, mid, 1)
    return dict(
        head=_fuse_1x1([b1, b2_head, b3_head]),
        b2_tail=[pg.cbr(mid, mid, (1, 7), padding=(0, 3)),
                 pg.cbr(mid, 192, (7, 1), padding=(3, 0))],
        b3_tail=[pg.cbr(mid, mid, (7, 1), padding=(3, 0)),
                 pg.cbr(mid, mid, (1, 7), padding=(0, 3)),
                 pg.cbr(mid, mid, (7, 1), padding=(3, 0)),
                 pg.cbr(mid, 192, (1, 7), padding=(0, 3))],
        b4=[pg.cbr(768, 192, 1)],
    )


def block2b_forward(p, x):
    h = apply_cbr(p["head"], x)
    b1, b2, b3 = _split_channels(h, p["head"]["splits"])
    b2 = seq(p["b2_tail"], b2)
    b3 = seq(p["b3_tail"], b3)
    b4 = pool2d(x, ksize=(3, 3), stride=(1, 1), padding=(1, 1), op="avg")
    b4 = seq(p["b4"], b4)
    return jnp.concatenate([b1, b2, b3, b4], axis=-1)


def make_block3a(pg, cin):
    b1_head = pg.cbr(cin, 192, 1)
    b2_head = pg.cbr(cin, 192, 1)
    return dict(
        head=_fuse_1x1([b1_head, b2_head]),
        b1_tail=[pg.cbr(192, 320, 3, stride=2)],
        b2_tail=[pg.cbr(192, 192, (1, 7), padding=(0, 3)),
                 pg.cbr(192, 192, (7, 1), padding=(3, 0)),
                 pg.cbr(192, 192, 3, stride=2)],
    )


def block3a_forward(p, x):
    h = apply_cbr(p["head"], x)
    h1, h2 = _split_channels(h, p["head"]["splits"])
    b1 = seq(p["b1_tail"], h1)
    b2 = seq(p["b2_tail"], h2)
    b3 = pool2d(x, ksize=(3, 3), stride=(2, 2), op="max")
    return jnp.concatenate([b1, b2, b3], axis=-1)


def make_block3b(pg, cin):
    b1 = pg.cbr(cin, 320, 1)
    b2a_head = pg.cbr(cin, 384, 1)
    b2b_head = pg.cbr(cin, 384, 1)
    b3a_head = pg.cbr(cin, 448, 1)
    b3b_head = pg.cbr(cin, 448, 1)
    return dict(
        head=_fuse_1x1([b1, b2a_head, b2b_head, b3a_head, b3b_head]),
        b2a_tail=[pg.cbr(384, 384, (1, 3), padding=(0, 1))],
        b2b_tail=[pg.cbr(384, 384, (3, 1), padding=(1, 0))],
        b3a_tail=[pg.cbr(448, 384, 3, padding=1),
                  pg.cbr(384, 384, (1, 3), padding=(0, 1))],
        b3b_tail=[pg.cbr(448, 384, 3, padding=1),
                  pg.cbr(384, 384, (3, 1), padding=(1, 0))],
        b4=[pg.cbr(cin, 192, 1)],
    )


def block3b_forward(p, x):
    h = apply_cbr(p["head"], x)
    b1, h2a, h2b, h3a, h3b = _split_channels(h, p["head"]["splits"])
    b2 = jnp.concatenate([seq(p["b2a_tail"], h2a), seq(p["b2b_tail"], h2b)], axis=-1)
    b3 = jnp.concatenate([seq(p["b3a_tail"], h3a), seq(p["b3b_tail"], h3b)], axis=-1)
    b4 = pool2d(x, ksize=(3, 3), stride=(1, 1), padding=(1, 1), op="avg")
    b4 = seq(p["b4"], b4)
    return jnp.concatenate([b1, b2, b3, b4], axis=-1)


# ----------------------------------------------------------------------------
# Full InceptionV3
# ----------------------------------------------------------------------------

def make_inception_v3(seed=0, num_classes=1000):
    pg = ParamGen(seed)
    return dict(
        conv_1=pg.cbr(3, 32, 3, stride=2),
        conv_2=pg.cbr(32, 32, 3),
        conv_3=pg.cbr(32, 64, 3, padding=1),
        conv_4=pg.cbr(64, 80, 1),
        conv_5=pg.cbr(80, 192, 3),
        block1_module1=make_block1(pg, 192, 32),
        block1_module2=make_block1(pg, 256, 64),
        block1_module3=make_block1(pg, 288, 64),
        block2_module1=make_block2a(pg, 288),
        block2_module2=make_block2b(pg, 768, 128),
        block2_module3=make_block2b(pg, 768, 160),
        block2_module4=make_block2b(pg, 768, 160),
        block2_module5=make_block2b(pg, 768, 192),
        block3_module1=make_block3a(pg, 768),
        block3_module2=make_block3b(pg, 1280),
        block3_module3=make_block3b(pg, 2048),
        classifier=pg.cbr(2048, num_classes, 1),
    )


def inception_v3_forward(params, x_nchw):
    x = jnp.transpose(x_nchw, (0, 2, 3, 1)).astype(jnp.bfloat16)
    x = apply_cbr(params["conv_1"], x)
    x = apply_cbr(params["conv_2"], x)
    x = apply_cbr(params["conv_3"], x)
    x = pool2d(x, ksize=(3, 3), stride=(2, 2), op="max")
    x = apply_cbr(params["conv_4"], x)
    x = apply_cbr(params["conv_5"], x)
    x = pool2d(x, ksize=(3, 3), stride=(2, 2), op="max")
    x = block1_forward(params["block1_module1"], x)
    x = block1_forward(params["block1_module2"], x)
    x = block1_forward(params["block1_module3"], x)
    x = block2a_forward(params["block2_module1"], x)
    x = block2b_forward(params["block2_module2"], x)
    x = block2b_forward(params["block2_module3"], x)
    x = block2b_forward(params["block2_module4"], x)
    x = block2b_forward(params["block2_module5"], x)
    x = block3a_forward(params["block3_module1"], x)
    x = block3b_forward(params["block3_module2"], x)
    x = block3b_forward(params["block3_module3"], x)
    x = pool2d(x, ksize=(8, 8), stride=(8, 8), op="max")
    # TODO(synk): nn.Dropout(p=0.5) treated as identity (inference mode).
    x = apply_cbr(params["classifier"], x, out_dtype=jnp.float32)
    x = jnp.transpose(x, (0, 3, 1, 2))           # NHWC -> NCHW before squeeze
    return jnp.squeeze(x)


if __name__ == "__main__":
    params = make_inception_v3(seed=0, num_classes=1000)
    key = jax.random.PRNGKey(0)
    # The module's MaxPool2d(kernel_size=8) implies the canonical 299x299 input.
    x = jax.random.normal(key, (1, 3, 299, 299), jnp.float32)
    out = inception_v3_forward(params, x)
    out = jax.block_until_ready(out)
    assert out.shape == (1000,), out.shape
    assert bool(jnp.all(jnp.isfinite(out))), "non-finite output"
    print("KERNEL_OK")
</pallas_src>

<mosaic_0001>
module attributes {stable_mosaic.version = 11 : i64} {
  func.func @_mm_bn_relu_kernel(%arg0: i32, %arg1: memref<512x27xbf16, #tpu.memory_space<vmem>>, %arg2: memref<27x32xbf16, #tpu.memory_space<vmem>>, %arg3: memref<1x32xf32, #tpu.memory_space<vmem>>, %arg4: memref<1x32xf32, #tpu.memory_space<vmem>>, %arg5: memref<512x32xbf16, #tpu.memory_space<vmem>>) attributes {dimension_semantics = [#tpu.dimension_semantics<parallel>], iteration_bounds = array<i64: 44>, scalar_prefetch = 0 : i64, scratch_operands = 0 : i64, tpu.core_type = #tpu.core_type<tc>, window_params = [{transform_indices = @transform_0, window_bounds = array<i64: 512, 27>}, {pipeline_mode = #tpu.pipeline_mode<synchronous>, transform_indices = @transform_1, window_bounds = array<i64: 27, 32>}, {pipeline_mode = #tpu.pipeline_mode<synchronous>, transform_indices = @transform_2, window_bounds = array<i64: 1, 32>}, {pipeline_mode = #tpu.pipeline_mode<synchronous>, transform_indices = @transform_3, window_bounds = array<i64: 1, 32>}, {transform_indices = @transform_4, window_bounds = array<i64: 512, 32>}]} {
    %c0 = arith.constant 0 : index
    %c0_0 = arith.constant 0 : index
    %0 = vector.load %arg1[%c0, %c0_0] : memref<512x27xbf16, #tpu.memory_space<vmem>>, vector<512x27xbf16>
    %c0_1 = arith.constant 0 : index
    %c0_2 = arith.constant 0 : index
    %1 = vector.load %arg2[%c0_1, %c0_2] : memref<27x32xbf16, #tpu.memory_space<vmem>>, vector<27x32xbf16>
    %cst = arith.constant dense<0.000000e+00> : vector<512x32xf32>
    %2 = tpu.matmul %0, %1, %cst {dimension_numbers = #tpu.dot_dimension_numbers<[1], [0], [0], [1], [0, 0, 1, 1], [], []>} : vector<512x27xbf16>, vector<27x32xbf16>, vector<512x32xf32> -> vector<512x32xf32>
    %c0_3 = arith.constant 0 : index
    %c0_4 = arith.constant 0 : index
    %3 = vector.load %arg3[%c0_3, %c0_4] : memref<1x32xf32, #tpu.memory_space<vmem>>, vector<1x32xf32>
    %4 = vector.broadcast %3 : vector<1x32xf32> to vector<512x32xf32>
    %5 = arith.mulf %2, %4 : vector<512x32xf32>
    %c0_5 = arith.constant 0 : index
    %c0_6 = arith.constant 0 : index
    %6 = vector.load %arg4[%c0_5, %c0_6] : memref<1x32xf32, #tpu.memory_space<vmem>>, vector<1x32xf32>
    %7 = vector.broadcast %6 : vector<1x32xf32> to vector<512x32xf32>
    %8 = arith.addf %5, %7 : vector<512x32xf32>
    %cst_7 = arith.constant 0.000000e+00 : f32
    %9 = vector.broadcast %cst_7 : f32 to vector<512x32xf32>
    %10 = arith.maximumf %8, %9 : vector<512x32xf32>
    %11 = arith.truncf %10 : vector<512x32xf32> to vector<512x32xbf16>
    %c0_8 = arith.constant 0 : index
    %c0_9 = arith.constant 0 : index
    %12 = vector.load %arg5[%c0_8, %c0_9] : memref<512x32xbf16, #tpu.memory_space<vmem>>, vector<512x32xbf16>
    tpu.vector_store %arg5[%c0_8, %c0_9], %11 {strides = array<i32>} : memref<512x32xbf16, #tpu.memory_space<vmem>>, vector<512x32xbf16>,
    return
  }
  func.func @transform_0(%arg0: i32) -> (i32, i32) {
    %c0_i32 = arith.constant 0 : i32
    %c0_i32_0 = arith.constant 0 : i32
    return %arg0, %c0_i32 : i32, i32
  }
  func.func @transform_1(%arg0: i32) -> (i32, i32) {
    %c0_i32 = arith.constant 0 : i32
    %c0_i32_0 = arith.constant 0 : i32
    %c0_i32_1 = arith.constant 0 : i32
    return %c0_i32, %c0_i32_0 : i32, i32
  }
  func.func @transform_2(%arg0: i32) -> (i32, i32) {
    %c0_i32 = arith.constant 0 : i32
    %c0_i32_0 = arith.constant 0 : i32
    %c0_i32_1 = arith.constant 0 : i32
    return %c0_i32, %c0_i32_0 : i32, i32
  }
  func.func @transform_3(%arg0: i32) -> (i32, i32) {
    %c0_i32 = arith.constant 0 : i32
    %c0_i32_0 = arith.constant 0 : i32
    %c0_i32_1 = arith.constant 0 : i32
    return %c0_i32, %c0_i32_0 : i32, i32
  }
  func.func @transform_4(%arg0: i32) -> (i32, i32) {
    %c0_i32 = arith.constant 0 : i32
    %c0_i32_0 = arith.constant 0 : i32
    return %arg0, %c0_i32 : i32, i32
  }
}

</mosaic_0001>

<bundles_post_ra>
// kernel: conv_bn_relu.1
= control target key start
LH: loop header
LB: loop body
LE: loop exit
PB: predicated region body
PF: predicated region fallthrough
CT: control target
= control target key end

     0   :  { %s1363_s15 = smov 0   ;;  %s1730_s0 = inlined_call_operand.vmem [shape: bf16[22528,27], index: 0, kind: input, shape index: {}]   ;;  %s1731_s1 = inlined_call_operand.vmem [shape: bf16[27,32], index: 1, kind: input, shape index: {}]   ;;  %s1732_s2 = inlined_call_operand.vmem [shape: f32[1,32], index: 2, kind: input, shape index: {}]   ;;  %s1733_s3 = inlined_call_operand.vmem [shape: f32[1,32], index: 3, kind: input, shape index: {}]   ;;  %s1734_s4 = inlined_call_operand.vmem [shape: bf16[22528,32], index: 4, kind: output, shape index: {}]  }
   0x1 LB: > { %s1099_s16 = sadd.s32 4294967295, %s1335_s15   ;;  %p1103_p0 = scmp.ge.s32.totalorder %s1335_s15, 1  ;;  %s1335_s15 = sphi %s1363_s15, %s14_s15  }
   0x2   : > { %p163_p1 = scmp.lt.s32.totalorder %s1335_s15, 45 }
   0x4   : > { %p164_p2 = pnand %p1103_p0, %p163_p1 }
   0x5   : > { %s1104_s21 = sshll.u32 (!%p164_p2), %s1099_s16, 6 }
   0x6   : > { %167 = sbr.rel (%p164_p2) target bundleno = 287 (0x11f), region = 36  ;;  %p190_p3 = scmp.lt.s32.totalorder (!%p164_p2), %s1104_s21, 2815 }
   0xb   : > { %v1242_v0 = vld [vmem:[%s1731_s1 + $0x8] sm:$0xf]  ;;  %v1311_v1 = vld [vmem:[%s1731_s1 + $0x8] sm:$0x30]  ;;  %vm538_vm0 = vcmask 1044480   ;;  %vm539_vm1 = vcmask 1045504  }
   0xc   : > { %v1243_v2 = vor.u32 %v1311_v1, %v1242_v0  ;;  %v1337_v3 = vmov 65535   ;;  %s1736_s21 = smov (!%p190_p3, %s1104_s21), 2815  ;;  %v1310_v7 = vld [vmem:[%s1731_s1] sm:$0xff]  ;;  %vm441_vm2 = vcmask 220160   ;;  %vm978_vm3 = vcmask 257024  }
   0xd   : > { %v540_v4 = vsel %vm538_vm0, 4294967295, %v1337_v3  ;;  %s1105_s24 = sshll.u32 %s1736_s21, 2  ;;  %v1457_v40 = vld [vmem:[%s1732_s2] ss:$0 sm:$0xff] }
   0xe   : > { %v541_v5 = vsel %vm539_vm1, %v540_v4, 0  ;;  %s1388_s27 = scalar_lea.vmem %s1730_s0, %s1105_s24  ;;  %v1462_v41 = vld [vmem:[%s1733_s3] ss:$0 sm:$0xff]  ;;  %s1473_s8 = scalar_lea.vmem %s1734_s4, %s1105_s24 }
   0xf   : > { %v543_v6 = vand.u32 %v1243_v2, %v541_v5  ;;  %v1278_v8 = vld [vmem:[%s1388_s27] sm:$0xff]  ;;  %v1279_v12 = vld [vmem:[%s1388_s27 + $0x8] sm:$0xff]  ;;  %v1280_v16 = vld [vmem:[%s1388_s27 + $0x10] sm:$0xff] }
  0x10   : > { %v1286_v9 = vld [vmem:[%s1388_s27 + $0x40] sm:$0xff]  ;;  %v1287_v13 = vld [vmem:[%s1388_s27 + $0x48] sm:$0xff]  ;;  %v1288_v17 = vld [vmem:[%s1388_s27 + $0x50] sm:$0xff] }
  0x11   : > { %551 = vmatpush.bf16.msra.mxu0 %v543_v6  ;;  %1312 = vmatpush.bf16.msra.mxu1 %v543_v6  ;;  %v1294_v10 = vld [vmem:[%s1388_s27 + $0x80] sm:$0xff]  ;;  %v1295_v14 = vld [vmem:[%s1388_s27 + $0x88] sm:$0xff]  ;;  %v1296_v18 = vld [vmem:[%s1388_s27 + $0x90] sm:$0xff] }
  0x12   : > { %1313 = vmatpush.bf16.msra.mxu2 %v543_v6  ;;  %1314 = vmatpush.bf16.msra.mxu3 %v543_v6  ;;  %v1302_v11 = vld [vmem:[%s1388_s27 + $0xc0] sm:$0xff]  ;;  %v1303_v15 = vld [vmem:[%s1388_s27 + $0xc8] sm:$0xff]  ;;  %v1304_v19 = vld [vmem:[%s1388_s27 + $0xd0] sm:$0xff] }
  0x13   : > { %v1281_v20 = vld [vmem:[%s1388_s27 + $0x18] sm:$0xff]  ;;  %v1282_v24 = vld [vmem:[%s1388_s27 + $0x20] sm:$0xff]  ;;  %v1283_v28 = vld [vmem:[%s1388_s27 + $0x28] sm:$0xff] }
  0x14   : > { %v1289_v21 = vld [vmem:[%s1388_s27 + $0x58] sm:$0xff]  ;;  %v1290_v25 = vld [vmem:[%s1388_s27 + $0x60] sm:$0xff]  ;;  %v1291_v29 = vld [vmem:[%s1388_s27 + $0x68] sm:$0xff] }
  0x15   : > { %552 = vmatpush.bf16.msra.mxu0 %v1310_v7  ;;  %1315 = vmatpush.bf16.msra.mxu1 %v1310_v7  ;;  %v1297_v22 = vld [vmem:[%s1388_s27 + $0x98] sm:$0xff]  ;;  %v1298_v26 = vld [vmem:[%s1388_s27 + $0xa0] sm:$0xff]  ;;  %v1299_v30 = vld [vmem:[%s1388_s27 + $0xa8] sm:$0xff] }
  0x16   : > { %1316 = vmatpush.bf16.msra.mxu2 %v1310_v7  ;;  %1317 = vmatpush.bf16.msra.mxu3 %v1310_v7  ;;  %v1305_v23 = vld [vmem:[%s1388_s27 + $0xd8] sm:$0xff]  ;;  %v1306_v27 = vld [vmem:[%s1388_s27 + $0xe0] sm:$0xff]  ;;  %v1307_v31 = vld [vmem:[%s1388_s27 + $0xe8] sm:$0xff] }
  0x17   : > { %v1284_v32 = vld [vmem:[%s1388_s27 + $0x30] sm:$0xff]  ;;  %v1285_v36 = vld [vmem:[%s1388_s27 + $0x38] sm:$0xff] }
  0x18   : > { %1244 = vmatmul.msk.bf16.vlgmr.msra.gmra.mxu0 %vm441_vm2, %v1278_v8  ;;  %1252 = vmatmul.msk.bf16.vlgmr.msra.gmra.mxu1 %vm441_vm2, %v1286_v9  ;;  %v1292_v33 = vld [vmem:[%s1388_s27 + $0x70] sm:$0xff]  ;;  %v1293_v37 = vld [vmem:[%s1388_s27 + $0x78] sm:$0xff] }
  0x19   : > { %1260 = vmatmul.msk.bf16.vlgmr.msra.gmra.mxu2 %vm441_vm2, %v1294_v10  ;;  %1268 = vmatmul.msk.bf16.vlgmr.msra.gmra.mxu3 %vm441_vm2, %v1302_v11  ;;  %v1300_v34 = vld [vmem:[%s1388_s27 + $0xb0] sm:$0xff]  ;;  %v1301_v38 = vld [vmem:[%s1388_s27 + $0xb8] sm:$0xff] }
  0x1a   : > { %v1308_v35 = vld [vmem:[%s1388_s27 + $0xf0] sm:$0xff]  ;;  %v1309_v39 = vld [vmem:[%s1388_s27 + $0xf8] sm:$0xff] }
  0x28   : > { %1245 = vmatmul.msk.bf16.gmra.mxu0 %vm441_vm2, %v1279_v12  ;;  %1253 = vmatmul.msk.bf16.gmra.mxu1 %vm441_vm2, %v1287_v13 }
  0x29   : > { %1261 = vmatmul.msk.bf16.gmra.mxu2 %vm441_vm2, %v1295_v14  ;;  %1269 = vmatmul.msk.bf16.gmra.mxu3 %vm441_vm2, %v1303_v15 }
  0x38   : > { %1246 = vmatmul.msk.bf16.gmra.mxu0 %vm441_vm2, %v1280_v16  ;;  %1254 = vmatmul.msk.bf16.gmra.mxu1 %vm441_vm2, %v1288_v17 }
  0x39   : > { %1262 = vmatmul.msk.bf16.gmra.mxu2 %vm441_vm2, %v1296_v18  ;;  %1270 = vmatmul.msk.bf16.gmra.mxu3 %vm441_vm2, %v1304_v19 }
  0x48   : > { %1247 = vmatmul.msk.bf16.gmra.mxu0 %vm441_vm2, %v1281_v20  ;;  %1255 = vmatmul.msk.bf16.gmra.mxu1 %vm441_vm2, %v1289_v21 }
  0x49   : > { %1263 = vmatmul.msk.bf16.gmra.mxu2 %vm441_vm2, %v1297_v22  ;;  %1271 = vmatmul.msk.bf16.gmra.mxu3 %vm441_vm2, %v1305_v23 }
  0x58   : > { %1248 = vmatmul.msk.bf16.gmra.mxu0 %vm441_vm2, %v1282_v24  ;;  %1256 = vmatmul.msk.bf16.gmra.mxu1 %vm441_vm2, %v1290_v25 }
  0x59   : > { %1264 = vmatmul.msk.bf16.gmra.mxu2 %vm441_vm2, %v1298_v26  ;;  %1272 = vmatmul.msk.bf16.gmra.mxu3 %vm441_vm2, %v1306_v27 }
  0x68   : > { %1249 = vmatmul.msk.bf16.gmra.mxu0 %vm441_vm2, %v1283_v28  ;;  %1257 = vmatmul.msk.bf16.gmra.mxu1 %vm441_vm2, %v1291_v29 }
  0x69   : > { %1265 = vmatmul.msk.bf16.gmra.mxu2 %vm441_vm2, %v1299_v30  ;;  %1273 = vmatmul.msk.bf16.gmra.mxu3 %vm441_vm2, %v1307_v31 }
  0x78   : > { %1250 = vmatmul.msk.bf16.gmra.mxu0 %vm441_vm2, %v1284_v32  ;;  %1258 = vmatmul.msk.bf16.gmra.mxu1 %vm441_vm2, %v1292_v33 }
  0x79   : > { %1266 = vmatmul.msk.bf16.gmra.mxu2 %vm441_vm2, %v1300_v34  ;;  %1274 = vmatmul.msk.bf16.gmra.mxu3 %vm441_vm2, %v1308_v35 }
  0x88   : > { %1251 = vmatmul.msk.bf16.gmra.mxu0 %vm441_vm2, %v1285_v36  ;;  %1259 = vmatmul.msk.bf16.gmra.mxu1 %vm441_vm2, %v1293_v37 }
  0x89   : > { %1267 = vmatmul.msk.bf16.gmra.mxu2 %vm441_vm2, %v1301_v38  ;;  %1275 = vmatmul.msk.bf16.gmra.mxu3 %vm441_vm2, %v1309_v39 }
  0x95   : > { %v554_v42 = vpop.f32.mrf.mxu0  ;;  %v594_v43 = vpop.f32.mrf.mxu1 }
  0x96   : > { %v718_v44 = vmul.f32 %v1457_v40, %v554_v42  ;;  %v734_v45 = vmul.f32 %v1457_v40, %v594_v43 }
  0x98   : > { %v786_v46 = vadd.f32 %v1462_v41, %v718_v44  ;;  %v802_v47 = vadd.f32 %v1462_v41, %v734_v45 }
  0x9a   : > { %v850_v48 = vmax.f32 %v786_v46, 0.0  ;;  %v866_v49 = vmax.f32 %v802_v47, 0.0 }
  0x9c   : > { %v914_v50 = vpack.c.bf16 %v850_v48, %v850_v48  ;;  %v930_v51 = vpack.c.bf16 %v866_v49, %v866_v49  ;;  %v634_v52 = vpop.f32.mrf.mxu2  ;;  %v674_v53 = vpop.f32.mrf.mxu3 }
  0x9d   : > { %v750_v54 = vmul.f32 %v1457_v40, %v634_v52  ;;  %v766_v55 = vmul.f32 %v1457_v40, %v674_v53  ;;  %v556_v56 = vpop.f32.mrf.mxu0  ;;  %v596_v57 = vpop.f32.mrf.mxu1 }
  0x9e   : > { %979 = vst.msk [vmem:[%s1473_s8] sm:$0xf] %vm978_vm3, %v914_v50  ;;  %v719_v58 = vmul.f32 %v1457_v40, %v556_v56  ;;  %v735_v59 = vmul.f32 %v1457_v40, %v596_v57 }
  0x9f   : > { %995 = vst.msk [vmem:[%s1473_s8 + $0x40] sm:$0xf] %vm978_vm3, %v930_v51  ;;  %v818_v60 = vadd.f32 %v1462_v41, %v750_v54  ;;  %v834_v61 = vadd.f32 %v1462_v41, %v766_v55 }
  0xa0   : > { %v787_v62 = vadd.f32 %v1462_v41, %v719_v58  ;;  %v803_v63 = vadd.f32 %v1462_v41, %v735_v59 }
  0xa1   : > { %v882_v0 = vmax.f32 %v818_v60, 0.0  ;;  %v898_v1 = vmax.f32 %v834_v61, 0.0 }
  0xa2   : > { %v851_v2 = vmax.f32 %v787_v62, 0.0  ;;  %v867_v3 = vmax.f32 %v803_v63, 0.0 }
  0xa3   : > { %v946_v4 = vpack.c.bf16 %v882_v0, %v882_v0  ;;  %v962_v5 = vpack.c.bf16 %v898_v1, %v898_v1 }
  0xa4   : > { %v915_v6 = vpack.c.bf16 %v851_v2, %v851_v2  ;;  %v931_v7 = vpack.c.bf16 %v867_v3, %v867_v3  ;;  %v636_v8 = vpop.f32.mrf.mxu2  ;;  %v676_v9 = vpop.f32.mrf.mxu3 }
  0xa5   : > { %1011 = vst.msk [vmem:[%s1473_s8 + $0x80] sm:$0xf] %vm978_vm3, %v946_v4  ;;  %v751_v10 = vmul.f32 %v1457_v40, %v636_v8  ;;  %v767_v11 = vmul.f32 %v1457_v40, %v676_v9  ;;  %v559_v12 = vpop.f32.mrf.mxu0  ;;  %v599_v13 = vpop.f32.mrf.mxu1 }
  0xa6   : > { %1027 = vst.msk [vmem:[%s1473_s8 + $0xc0] sm:$0xf] %vm978_vm3, %v962_v5  ;;  %v720_v14 = vmul.f32 %v1457_v40, %v559_v12  ;;  %v736_v15 = vmul.f32 %v1457_v40, %v599_v13 }
  0xa7   : > { %980 = vst.msk [vmem:[%s1473_s8 + $0x4] sm:$0xf] %vm978_vm3, %v915_v6  ;;  %v819_v16 = vadd.f32 %v1462_v41, %v751_v10  ;;  %v835_v17 = vadd.f32 %v1462_v41, %v767_v11 }
  0xa8   : > { %996 = vst.msk [vmem:[%s1473_s8 + $0x44] sm:$0xf] %vm978_vm3, %v931_v7  ;;  %v788_v18 = vadd.f32 %v1462_v41, %v720_v14  ;;  %v804_v19 = vadd.f32 %v1462_v41, %v736_v15 }
  0xa9   : > { %v883_v20 = vmax.f32 %v819_v16, 0.0  ;;  %v899_v21 = vmax.f32 %v835_v17, 0.0 }
  0xaa   : > { %v852_v22 = vmax.f32 %v788_v18, 0.0  ;;  %v868_v23 = vmax.f32 %v804_v19, 0.0 }
  0xab   : > { %v947_v24 = vpack.c.bf16 %v883_v20, %v883_v20  ;;  %v963_v25 = vpack.c.bf16 %v899_v21, %v899_v21 }
  0xac   : > { %v916_v26 = vpack.c.bf16 %v852_v22, %v852_v22  ;;  %v932_v27 = vpack.c.bf16 %v868_v23, %v868_v23  ;;  %v639_v28 = vpop.f32.mrf.mxu2  ;;  %v679_v29 = vpop.f32.mrf.mxu3 }
  0xad   : > { %1012 = vst.msk [vmem:[%s1473_s8 + $0x84] sm:$0xf] %vm978_vm3, %v947_v24  ;;  %v752_v30 = vmul.f32 %v1457_v40, %v639_v28  ;;  %v768_v31 = vmul.f32 %v1457_v40, %v679_v29  ;;  %v561_v32 = vpop.f32.mrf.mxu0  ;;  %v601_v33 = vpop.f32.mrf.mxu1 }
  0xae   : > { %1028 = vst.msk [vmem:[%s1473_s8 + $0xc4] sm:$0xf] %vm978_vm3, %v963_v25  ;;  %v721_v34 = vmul.f32 %v1457_v40, %v561_v32  ;;  %v737_v35 = vmul.f32 %v1457_v40, %v601_v33 }
  0xaf   : > { %981 = vst.msk [vmem:[%s1473_s8 + $0x8] sm:$0xf] %vm978_vm3, %v916_v26  ;;  %v820_v36 = vadd.f32 %v1462_v41, %v752_v30  ;;  %v836_v37 = vadd.f32 %v1462_v41, %v768_v31 }
  0xb0   : > { %997 = vst.msk [vmem:[%s1473_s8 + $0x48] sm:$0xf] %vm978_vm3, %v932_v27  ;;  %v789_v38 = vadd.f32 %v1462_v41, %v721_v34  ;;  %v805_v39 = vadd.f32 %v1462_v41, %v737_v35 }
  0xb1   : > { %v884_v42 = vmax.f32 %v820_v36, 0.0  ;;  %v900_v43 = vmax.f32 %v836_v37, 0.0 }
  0xb2   : > { %v853_v44 = vmax.f32 %v789_v38, 0.0  ;;  %v869_v45 = vmax.f32 %v805_v39, 0.0 }
  0xb3   : > { %v948_v46 = vpack.c.bf16 %v884_v42, %v884_v42  ;;  %v964_v47 = vpack.c.bf16 %v900_v43, %v900_v43 }
  0xb4   : > { %v917_v48 = vpack.c.bf16 %v853_v44, %v853_v44  ;;  %v933_v49 = vpack.c.bf16 %v869_v45, %v869_v45  ;;  %v641_v50 = vpop.f32.mrf.mxu2  ;;  %v681_v51 = vpop.f32.mrf.mxu3 }
  0xb5   : > { %1013 = vst.msk [vmem:[%s1473_s8 + $0x88] sm:$0xf] %vm978_vm3, %v948_v46  ;;  %v753_v52 = vmul.f32 %v1457_v40, %v641_v50  ;;  %v769_v53 = vmul.f32 %v1457_v40, %v681_v51  ;;  %v564_v54 = vpop.f32.mrf.mxu0  ;;  %v604_v55 = vpop.f32.mrf.mxu1 }
  0xb6   : > { %1029 = vst.msk [vmem:[%s1473_s8 + $0xc8] sm:$0xf] %vm978_vm3, %v964_v47  ;;  %v722_v56 = vmul.f32 %v1457_v40, %v564_v54  ;;  %v738_v57 = vmul.f32 %v1457_v40, %v604_v55 }
  0xb7   : > { %982 = vst.msk [vmem:[%s1473_s8 + $0xc] sm:$0xf] %vm978_vm3, %v917_v48  ;;  %v821_v58 = vadd.f32 %v1462_v41, %v753_v52  ;;  %v837_v59 = vadd.f32 %v1462_v41, %v769_v53 }
  0xb8   : > { %998 = vst.msk [vmem:[%s1473_s8 + $0x4c] sm:$0xf] %vm978_vm3, %v933_v49  ;;  %v790_v60 = vadd.f32 %v1462_v41, %v722_v56  ;;  %v806_v61 = vadd.f32 %v1462_v41, %v738_v57 }
  0xb9   : > { %v885_v62 = vmax.f32 %v821_v58, 0.0  ;;  %v901_v63 = vmax.f32 %v837_v59, 0.0 }
  0xba   : > { %v854_v0 = vmax.f32 %v790_v60, 0.0  ;;  %v870_v1 = vmax.f32 %v806_v61, 0.0 }
  0xbb   : > { %v949_v2 = vpack.c.bf16 %v885_v62, %v885_v62  ;;  %v965_v3 = vpack.c.bf16 %v901_v63, %v901_v63 }
  0xbc   : > { %v918_v4 = vpack.c.bf16 %v854_v0, %v854_v0  ;;  %v934_v5 = vpack.c.bf16 %v870_v1, %v870_v1  ;;  %v644_v6 = vpop.f32.mrf.mxu2  ;;  %v684_v7 = vpop.f32.mrf.mxu3 }
  0xbd   : > { %1014 = vst.msk [vmem:[%s1473_s8 + $0x8c] sm:$0xf] %vm978_vm3, %v949_v2  ;;  %v754_v8 = vmul.f32 %v1457_v40, %v644_v6  ;;  %v770_v9 = vmul.f32 %v1457_v40, %v684_v7  ;;  %v566_v10 = vpop.f32.mrf.mxu0  ;;  %v606_v11 = vpop.f32.mrf.mxu1 }
  0xbe   : > { %1030 = vst.msk [vmem:[%s1473_s8 + $0xcc] sm:$0xf] %vm978_vm3, %v965_v3  ;;  %v723_v12 = vmul.f32 %v1457_v40, %v566_v10  ;;  %v739_v13 = vmul.f32 %v1457_v40, %v606_v11 }
  0xbf   : > { %983 = vst.msk [vmem:[%s1473_s8 + $0x10] sm:$0xf] %vm978_vm3, %v918_v4  ;;  %v822_v14 = vadd.f32 %v1462_v41, %v754_v8  ;;  %v838_v15 = vadd.f32 %v1462_v41, %v770_v9 }
  0xc0   : > { %999 = vst.msk [vmem:[%s1473_s8 + $0x50] sm:$0xf] %vm978_vm3, %v934_v5  ;;  %v791_v16 = vadd.f32 %v1462_v41, %v723_v12  ;;  %v807_v17 = vadd.f32 %v1462_v41, %v739_v13 }
  0xc1   : > { %v886_v18 = vmax.f32 %v822_v14, 0.0  ;;  %v902_v19 = vmax.f32 %v838_v15, 0.0 }
  0xc2   : > { %v855_v20 = vmax.f32 %v791_v16, 0.0  ;;  %v871_v21 = vmax.f32 %v807_v17, 0.0 }
  0xc3   : > { %v950_v22 = vpack.c.bf16 %v886_v18, %v886_v18  ;;  %v966_v23 = vpack.c.bf16 %v902_v19, %v902_v19 }
  0xc4   : > { %v919_v24 = vpack.c.bf16 %v855_v20, %v855_v20  ;;  %v935_v25 = vpack.c.bf16 %v871_v21, %v871_v21  ;;  %v646_v26 = vpop.f32.mrf.mxu2  ;;  %v686_v27 = vpop.f32.mrf.mxu3 }
  0xc5   : > { %1015 = vst.msk [vmem:[%s1473_s8 + $0x90] sm:$0xf] %vm978_vm3, %v950_v22  ;;  %v755_v28 = vmul.f32 %v1457_v40, %v646_v26  ;;  %v771_v29 = vmul.f32 %v1457_v40, %v686_v27  ;;  %v569_v30 = vpop.f32.mrf.mxu0  ;;  %v609_v31 = vpop.f32.mrf.mxu1 }
  0xc6   : > { %1031 = vst.msk [vmem:[%s1473_s8 + $0xd0] sm:$0xf] %vm978_vm3, %v966_v23  ;;  %v724_v32 = vmul.f32 %v1457_v40, %v569_v30  ;;  %v740_v33 = vmul.f32 %v1457_v40, %v609_v31 }
  0xc7   : > { %984 = vst.msk [vmem:[%s1473_s8 + $0x14] sm:$0xf] %vm978_vm3, %v919_v24  ;;  %v823_v34 = vadd.f32 %v1462_v41, %v755_v28  ;;  %v839_v35 = vadd.f32 %v1462_v41, %v771_v29 }
  0xc8   : > { %1000 = vst.msk [vmem:[%s1473_s8 + $0x54] sm:$0xf] %vm978_vm3, %v935_v25  ;;  %v792_v36 = vadd.f32 %v1462_v41, %v724_v32  ;;  %v808_v37 = vadd.f32 %v1462_v41, %v740_v33 }
  0xc9   : > { %v887_v38 = vmax.f32 %v823_v34, 0.0  ;;  %v903_v39 = vmax.f32 %v839_v35, 0.0 }
  0xca   : > { %v856_v42 = vmax.f32 %v792_v36, 0.0  ;;  %v872_v43 = vmax.f32 %v808_v37, 0.0 }
  0xcb   : > { %v951_v44 = vpack.c.bf16 %v887_v38, %v887_v38  ;;  %v967_v45 = vpack.c.bf16 %v903_v39, %v903_v39 }
  0xcc   : > { %v920_v46 = vpack.c.bf16 %v856_v42, %v856_v42  ;;  %v936_v47 = vpack.c.bf16 %v872_v43, %v872_v43  ;;  %v649_v48 = vpop.f32.mrf.mxu2  ;;  %v689_v49 = vpop.f32.mrf.mxu3 }
  0xcd   : > { %1016 = vst.msk [vmem:[%s1473_s8 + $0x94] sm:$0xf] %vm978_vm3, %v951_v44  ;;  %v756_v50 = vmul.f32 %v1457_v40, %v649_v48  ;;  %v772_v51 = vmul.f32 %v1457_v40, %v689_v49  ;;  %v571_v52 = vpop.f32.mrf.mxu0  ;;  %v611_v53 = vpop.f32.mrf.mxu1 }
  0xce   : > { %1032 = vst.msk [vmem:[%s1473_s8 + $0xd4] sm:$0xf] %vm978_vm3, %v967_v45  ;;  %v725_v54 = vmul.f32 %v1457_v40, %v571_v52  ;;  %v741_v55 = vmul.f32 %v1457_v40, %v611_v53 }
  0xcf   : > { %985 = vst.msk [vmem:[%s1473_s8 + $0x18] sm:$0xf] %vm978_vm3, %v920_v46  ;;  %v824_v56 = vadd.f32 %v1462_v41, %v756_v50  ;;  %v840_v57 = vadd.f32 %v1462_v41, %v772_v51 }
  0xd0   : > { %1001 = vst.msk [vmem:[%s1473_s8 + $0x58] sm:$0xf] %vm978_vm3, %v936_v47  ;;  %v793_v58 = vadd.f32 %v1462_v41, %v725_v54  ;;  %v809_v59 = vadd.f32 %v1462_v41, %v741_v55 }
  0xd1   : > { %v888_v60 = vmax.f32 %v824_v56, 0.0  ;;  %v904_v61 = vmax.f32 %v840_v57, 0.0 }
  0xd2   : > { %v857_v62 = vmax.f32 %v793_v58, 0.0  ;;  %v873_v63 = vmax.f32 %v809_v59, 0.0 }
  0xd3   : > { %v952_v0 = vpack.c.bf16 %v888_v60, %v888_v60  ;;  %v968_v1 = vpack.c.bf16 %v904_v61, %v904_v61 }
  0xd4   : > { %v921_v2 = vpack.c.bf16 %v857_v62, %v857_v62  ;;  %v937_v3 = vpack.c.bf16 %v873_v63, %v873_v63  ;;  %v651_v4 = vpop.f32.mrf.mxu2  ;;  %v691_v5 = vpop.f32.mrf.mxu3 }
  0xd5   : > { %1017 = vst.msk [vmem:[%s1473_s8 + $0x98] sm:$0xf] %vm978_vm3, %v952_v0  ;;  %v757_v6 = vmul.f32 %v1457_v40, %v651_v4  ;;  %v773_v7 = vmul.f32 %v1457_v40, %v691_v5  ;;  %v574_v8 = vpop.f32.mrf.mxu0  ;;  %v614_v9 = vpop.f32.mrf.mxu1 }
  0xd6   : > { %1033 = vst.msk [vmem:[%s1473_s8 + $0xd8] sm:$0xf] %vm978_vm3, %v968_v1  ;;  %v726_v10 = vmul.f32 %v1457_v40, %v574_v8  ;;  %v742_v11 = vmul.f32 %v1457_v40, %v614_v9 }
  0xd7   : > { %986 = vst.msk [vmem:[%s1473_s8 + $0x1c] sm:$0xf] %vm978_vm3, %v921_v2  ;;  %v825_v12 = vadd.f32 %v1462_v41, %v757_v6  ;;  %v841_v13 = vadd.f32 %v1462_v41, %v773_v7 }
  0xd8   : > { %1002 = vst.msk [vmem:[%s1473_s8 + $0x5c] sm:$0xf] %vm978_vm3, %v937_v3  ;;  %v794_v14 = vadd.f32 %v1462_v41, %v726_v10  ;;  %v810_v15 = vadd.f32 %v1462_v41, %v742_v11 }
  0xd9   : > { %v889_v16 = vmax.f32 %v825_v12, 0.0  ;;  %v905_v17 = vmax.f32 %v841_v13, 0.0 }
  0xda   : > { %v858_v18 = vmax.f32 %v794_v14, 0.0  ;;  %v874_v19 = vmax.f32 %v810_v15, 0.0 }
  0xdb   : > { %v953_v20 = vpack.c.bf16 %v889_v16, %v889_v16  ;;  %v969_v21 = vpack.c.bf16 %v905_v17, %v905_v17 }
  0xdc   : > { %v922_v22 = vpack.c.bf16 %v858_v18, %v858_v18  ;;  %v938_v23 = vpack.c.bf16 %v874_v19, %v874_v19  ;;  %v654_v24 = vpop.f32.mrf.mxu2  ;;  %v694_v25 = vpop.f32.mrf.mxu3 }
  0xdd   : > { %1018 = vst.msk [vmem:[%s1473_s8 + $0x9c] sm:$0xf] %vm978_vm3, %v953_v20  ;;  %v758_v26 = vmul.f32 %v1457_v40, %v654_v24  ;;  %v774_v27 = vmul.f32 %v1457_v40, %v694_v25  ;;  %v576_v28 = vpop.f32.mrf.mxu0  ;;  %v616_v29 = vpop.f32.mrf.mxu1 }
  0xde   : > { %1034 = vst.msk [vmem:[%s1473_s8 + $0xdc] sm:$0xf] %vm978_vm3, %v969_v21  ;;  %v727_v30 = vmul.f32 %v1457_v40, %v576_v28  ;;  %v743_v31 = vmul.f32 %v1457_v40, %v616_v29 }
  0xdf   : > { %987 = vst.msk [vmem:[%s1473_s8 + $0x20] sm:$0xf] %vm978_vm3, %v922_v22  ;;  %v826_v32 = vadd.f32 %v1462_v41, %v758_v26  ;;  %v842_v33 = vadd.f32 %v1462_v41, %v774_v27 }
  0xe0   : > { %1003 = vst.msk [vmem:[%s1473_s8 + $0x60] sm:$0xf] %vm978_vm3, %v938_v23  ;;  %v795_v34 = vadd.f32 %v1462_v41, %v727_v30  ;;  %v811_v35 = vadd.f32 %v1462_v41, %v743_v31 }
  0xe1   : > { %v890_v36 = vmax.f32 %v826_v32, 0.0  ;;  %v906_v37 = vmax.f32 %v842_v33, 0.0 }
  0xe2   : > { %v859_v38 = vmax.f32 %v795_v34, 0.0  ;;  %v875_v39 = vmax.f32 %v811_v35, 0.0 }
  0xe3   : > { %v954_v42 = vpack.c.bf16 %v890_v36, %v890_v36  ;;  %v970_v43 = vpack.c.bf16 %v906_v37, %v906_v37 }
  0xe4   : > { %v923_v44 = vpack.c.bf16 %v859_v38, %v859_v38  ;;  %v939_v45 = vpack.c.bf16 %v875_v39, %v875_v39  ;;  %v656_v46 = vpop.f32.mrf.mxu2  ;;  %v696_v47 = vpop.f32.mrf.mxu3 }
  0xe5   : > { %1019 = vst.msk [vmem:[%s1473_s8 + $0xa0] sm:$0xf] %vm978_vm3, %v954_v42  ;;  %v759_v48 = vmul.f32 %v1457_v40, %v656_v46  ;;  %v775_v49 = vmul.f32 %v1457_v40, %v696_v47  ;;  %v579_v50 = vpop.f32.mrf.mxu0  ;;  %v619_v51 = vpop.f32.mrf.mxu1 }
  0xe6   : > { %1035 = vst.msk [vmem:[%s1473_s8 + $0xe0] sm:$0xf] %vm978_vm3, %v970_v43  ;;  %v728_v52 = vmul.f32 %v1457_v40, %v579_v50  ;;  %v744_v53 = vmul.f32 %v1457_v40, %v619_v51 }
  0xe7   : > { %988 = vst.msk [vmem:[%s1473_s8 + $0x24] sm:$0xf] %vm978_vm3, %v923_v44  ;;  %v827_v54 = vadd.f32 %v1462_v41, %v759_v48  ;;  %v843_v55 = vadd.f32 %v1462_v41, %v775_v49 }
  0xe8   : > { %1004 = vst.msk [vmem:[%s1473_s8 + $0x64] sm:$0xf] %vm978_vm3, %v939_v45  ;;  %v796_v56 = vadd.f32 %v1462_v41, %v728_v52  ;;  %v812_v57 = vadd.f32 %v1462_v41, %v744_v53 }
  0xe9   : > { %v891_v58 = vmax.f32 %v827_v54, 0.0  ;;  %v907_v59 = vmax.f32 %v843_v55, 0.0 }
  0xea   : > { %v860_v60 = vmax.f32 %v796_v56, 0.0  ;;  %v876_v61 = vmax.f32 %v812_v57, 0.0 }
  0xeb   : > { %v955_v62 = vpack.c.bf16 %v891_v58, %v891_v58  ;;  %v971_v63 = vpack.c.bf16 %v907_v59, %v907_v59 }
  0xec   : > { %v924_v0 = vpack.c.bf16 %v860_v60, %v860_v60  ;;  %v940_v1 = vpack.c.bf16 %v876_v61, %v876_v61  ;;  %v659_v2 = vpop.f32.mrf.mxu2  ;;  %v699_v3 = vpop.f32.mrf.mxu3 }
  0xed   : > { %1020 = vst.msk [vmem:[%s1473_s8 + $0xa4] sm:$0xf] %vm978_vm3, %v955_v62  ;;  %v760_v4 = vmul.f32 %v1457_v40, %v659_v2  ;;  %v776_v5 = vmul.f32 %v1457_v40, %v699_v3  ;;  %v581_v6 = vpop.f32.mrf.mxu0  ;;  %v621_v7 = vpop.f32.mrf.mxu1 }
  0xee   : > { %1036 = vst.msk [vmem:[%s1473_s8 + $0xe4] sm:$0xf] %vm978_vm3, %v971_v63  ;;  %v729_v8 = vmul.f32 %v1457_v40, %v581_v6  ;;  %v745_v9 = vmul.f32 %v1457_v40, %v621_v7 }
  0xef   : > { %989 = vst.msk [vmem:[%s1473_s8 + $0x28] sm:$0xf] %vm978_vm3, %v924_v0  ;;  %v828_v10 = vadd.f32 %v1462_v41, %v760_v4  ;;  %v844_v11 = vadd.f32 %v1462_v41, %v776_v5 }
  0xf0   : > { %1005 = vst.msk [vmem:[%s1473_s8 + $0x68] sm:$0xf] %vm978_vm3, %v940_v1  ;;  %v797_v12 = vadd.f32 %v1462_v41, %v729_v8  ;;  %v813_v13 = vadd.f32 %v1462_v41, %v745_v9 }
  0xf1   : > { %v892_v14 = vmax.f32 %v828_v10, 0.0  ;;  %v908_v15 = vmax.f32 %v844_v11, 0.0 }
  0xf2   : > { %v861_v16 = vmax.f32 %v797_v12, 0.0  ;;  %v877_v17 = vmax.f32 %v813_v13, 0.0 }
  0xf3   : > { %v956_v18 = vpack.c.bf16 %v892_v14, %v892_v14  ;;  %v972_v19 = vpack.c.bf16 %v908_v15, %v908_v15 }
  0xf4   : > { %v925_v20 = vpack.c.bf16 %v861_v16, %v861_v16  ;;  %v941_v21 = vpack.c.bf16 %v877_v17, %v877_v17  ;;  %v661_v22 = vpop.f32.mrf.mxu2  ;;  %v701_v23 = vpop.f32.mrf.mxu3 }
  0xf5   : > { %1021 = vst.msk [vmem:[%s1473_s8 + $0xa8] sm:$0xf] %vm978_vm3, %v956_v18  ;;  %v761_v24 = vmul.f32 %v1457_v40, %v661_v22  ;;  %v777_v25 = vmul.f32 %v1457_v40, %v701_v23  ;;  %v584_v26 = vpop.f32.mrf.mxu0  ;;  %v624_v27 = vpop.f32.mrf.mxu1 }
  0xf6   : > { %1037 = vst.msk [vmem:[%s1473_s8 + $0xe8] sm:$0xf] %vm978_vm3, %v972_v19  ;;  %v730_v28 = vmul.f32 %v1457_v40, %v584_v26  ;;  %v746_v29 = vmul.f32 %v1457_v40, %v624_v27 }
  0xf7   : > { %990 = vst.msk [vmem:[%s1473_s8 + $0x2c] sm:$0xf] %vm978_vm3, %v925_v20  ;;  %v829_v30 = vadd.f32 %v1462_v41, %v761_v24  ;;  %v845_v31 = vadd.f32 %v1462_v41, %v777_v25 }
  0xf8   : > { %1006 = vst.msk [vmem:[%s1473_s8 + $0x6c] sm:$0xf] %vm978_vm3, %v941_v21  ;;  %v798_v32 = vadd.f32 %v1462_v41, %v730_v28  ;;  %v814_v33 = vadd.f32 %v1462_v41, %v746_v29 }
  0xf9   : > { %v893_v34 = vmax.f32 %v829_v30, 0.0  ;;  %v909_v35 = vmax.f32 %v845_v31, 0.0 }
  0xfa   : > { %v862_v36 = vmax.f32 %v798_v32, 0.0  ;;  %v878_v37 = vmax.f32 %v814_v33, 0.0 }
  0xfb   : > { %v957_v38 = vpack.c.bf16 %v893_v34, %v893_v34  ;;  %v973_v39 = vpack.c.bf16 %v909_v35, %v909_v35 }
  0xfc   : > { %v926_v42 = vpack.c.bf16 %v862_v36, %v862_v36  ;;  %v942_v43 = vpack.c.bf16 %v878_v37, %v878_v37  ;;  %v664_v44 = vpop.f32.mrf.mxu2  ;;  %v704_v45 = vpop.f32.mrf.mxu3 }
  0xfd   : > { %1022 = vst.msk [vmem:[%s1473_s8 + $0xac] sm:$0xf] %vm978_vm3, %v957_v38  ;;  %v762_v46 = vmul.f32 %v1457_v40, %v664_v44  ;;  %v778_v47 = vmul.f32 %v1457_v40, %v704_v45  ;;  %v586_v48 = vpop.f32.mrf.mxu0  ;;  %v626_v49 = vpop.f32.mrf.mxu1 }
  0xfe   : > { %1038 = vst.msk [vmem:[%s1473_s8 + $0xec] sm:$0xf] %vm978_vm3, %v973_v39  ;;  %v731_v50 = vmul.f32 %v1457_v40, %v586_v48  ;;  %v747_v51 = vmul.f32 %v1457_v40, %v626_v49 }
  0xff   : > { %991 = vst.msk [vmem:[%s1473_s8 + $0x30] sm:$0xf] %vm978_vm3, %v926_v42  ;;  %v830_v52 = vadd.f32 %v1462_v41, %v762_v46  ;;  %v846_v53 = vadd.f32 %v1462_v41, %v778_v47 }
 0x100   : > { %1007 = vst.msk [vmem:[%s1473_s8 + $0x70] sm:$0xf] %vm978_vm3, %v942_v43  ;;  %v799_v54 = vadd.f32 %v1462_v41, %v731_v50  ;;  %v815_v55 = vadd.f32 %v1462_v41, %v747_v51 }
 0x101   : > { %v894_v56 = vmax.f32 %v830_v52, 0.0  ;;  %v910_v57 = vmax.f32 %v846_v53, 0.0 }
 0x102   : > { %v863_v58 = vmax.f32 %v799_v54, 0.0  ;;  %v879_v59 = vmax.f32 %v815_v55, 0.0 }
 0x103   : > { %v958_v60 = vpack.c.bf16 %v894_v56, %v894_v56  ;;  %v974_v61 = vpack.c.bf16 %v910_v57, %v910_v57 }
 0x104   : > { %v927_v62 = vpack.c.bf16 %v863_v58, %v863_v58  ;;  %v943_v63 = vpack.c.bf16 %v879_v59, %v879_v59  ;;  %v666_v0 = vpop.f32.mrf.mxu2  ;;  %v706_v1 = vpop.f32.mrf.mxu3 }
 0x105   : > { %1023 = vst.msk [vmem:[%s1473_s8 + $0xb0] sm:$0xf] %vm978_vm3, %v958_v60  ;;  %v763_v2 = vmul.f32 %v1457_v40, %v666_v0  ;;  %v779_v3 = vmul.f32 %v1457_v40, %v706_v1  ;;  %v589_v4 = vpop.f32.mrf.mxu0  ;;  %v629_v5 = vpop.f32.mrf.mxu1 }
 0x106   : > { %1039 = vst.msk [vmem:[%s1473_s8 + $0xf0] sm:$0xf] %vm978_vm3, %v974_v61  ;;  %v732_v6 = vmul.f32 %v1457_v40, %v589_v4  ;;  %v748_v7 = vmul.f32 %v1457_v40, %v629_v5 }
 0x107   : > { %992 = vst.msk [vmem:[%s1473_s8 + $0x34] sm:$0xf] %vm978_vm3, %v927_v62  ;;  %v831_v8 = vadd.f32 %v1462_v41, %v763_v2  ;;  %v847_v9 = vadd.f32 %v1462_v41, %v779_v3 }
 0x108   : > { %1008 = vst.msk [vmem:[%s1473_s8 + $0x74] sm:$0xf] %vm978_vm3, %v943_v63  ;;  %v800_v10 = vadd.f32 %v1462_v41, %v732_v6  ;;  %v816_v11 = vadd.f32 %v1462_v41, %v748_v7 }
 0x109   : > { %v895_v12 = vmax.f32 %v831_v8, 0.0  ;;  %v911_v13 = vmax.f32 %v847_v9, 0.0 }
 0x10a   : > { %v864_v14 = vmax.f32 %v800_v10, 0.0  ;;  %v880_v15 = vmax.f32 %v816_v11, 0.0 }
 0x10b   : > { %v959_v16 = vpack.c.bf16 %v895_v12, %v895_v12  ;;  %v975_v17 = vpack.c.bf16 %v911_v13, %v911_v13 }
 0x10c   : > { %v928_v18 = vpack.c.bf16 %v864_v14, %v864_v14  ;;  %v944_v19 = vpack.c.bf16 %v880_v15, %v880_v15  ;;  %v669_v20 = vpop.f32.mrf.mxu2  ;;  %v709_v21 = vpop.f32.mrf.mxu3 }
 0x10d   : > { %1024 = vst.msk [vmem:[%s1473_s8 + $0xb4] sm:$0xf] %vm978_vm3, %v959_v16  ;;  %v764_v22 = vmul.f32 %v1457_v40, %v669_v20  ;;  %v780_v23 = vmul.f32 %v1457_v40, %v709_v21  ;;  %v591_v24 = vpop.f32.mrf.mxu0  ;;  %v631_v25 = vpop.f32.mrf.mxu1 }
 0x10e   : > { %1040 = vst.msk [vmem:[%s1473_s8 + $0xf4] sm:$0xf] %vm978_vm3, %v975_v17  ;;  %v733_v26 = vmul.f32 %v1457_v40, %v591_v24  ;;  %v749_v27 = vmul.f32 %v1457_v40, %v631_v25 }
 0x10f   : > { %993 = vst.msk [vmem:[%s1473_s8 + $0x38] sm:$0xf] %vm978_vm3, %v928_v18  ;;  %v832_v28 = vadd.f32 %v1462_v41, %v764_v22  ;;  %v848_v29 = vadd.f32 %v1462_v41, %v780_v23 }
 0x110   : > { %1009 = vst.msk [vmem:[%s1473_s8 + $0x78] sm:$0xf] %vm978_vm3, %v944_v19  ;;  %v801_v30 = vadd.f32 %v1462_v41, %v733_v26  ;;  %v817_v31 = vadd.f32 %v1462_v41, %v749_v27 }
 0x111   : > { %v896_v32 = vmax.f32 %v832_v28, 0.0  ;;  %v912_v33 = vmax.f32 %v848_v29, 0.0 }
 0x112   : > { %v865_v34 = vmax.f32 %v801_v30, 0.0  ;;  %v881_v35 = vmax.f32 %v817_v31, 0.0 }
 0x113   : > { %v960_v36 = vpack.c.bf16 %v896_v32, %v896_v32  ;;  %v976_v37 = vpack.c.bf16 %v912_v33, %v912_v33 }
 0x114   : > { %v929_v38 = vpack.c.bf16 %v865_v34, %v865_v34  ;;  %v945_v39 = vpack.c.bf16 %v881_v35, %v881_v35  ;;  %v671_v42 = vpop.f32.mrf.mxu2  ;;  %v711_v43 = vpop.f32.mrf.mxu3 }
 0x115   : > { %1025 = vst.msk [vmem:[%s1473_s8 + $0xb8] sm:$0xf] %vm978_vm3, %v960_v36  ;;  %v765_v44 = vmul.f32 %v1457_v40, %v671_v42  ;;  %v781_v45 = vmul.f32 %v1457_v40, %v711_v43 }
 0x116   : > { %1041 = vst.msk [vmem:[%s1473_s8 + $0xf8] sm:$0xf] %vm978_vm3, %v976_v37 }
 0x117   : > { %994 = vst.msk [vmem:[%s1473_s8 + $0x3c] sm:$0xf] %vm978_vm3, %v929_v38  ;;  %v833_v46 = vadd.f32 %v1462_v41, %v765_v44  ;;  %v849_v47 = vadd.f32 %v1462_v41, %v781_v45 }
 0x118   : > { %1010 = vst.msk [vmem:[%s1473_s8 + $0x7c] sm:$0xf] %vm978_vm3, %v945_v39 }
 0x119   : > { %v897_v48 = vmax.f32 %v833_v46, 0.0  ;;  %v913_v49 = vmax.f32 %v849_v47, 0.0 }
 0x11b   : > { %v961_v50 = vpack.c.bf16 %v897_v48, %v897_v48  ;;  %v977_v51 = vpack.c.bf16 %v913_v49, %v913_v49 }
 0x11d   : > { %1026 = vst.msk [vmem:[%s1473_s8 + $0xbc] sm:$0xf] %vm978_vm3, %v961_v50 }
 0x11e   : > { %1042 = vst.msk [vmem:[%s1473_s8 + $0xfc] sm:$0xf] %vm978_vm3, %v977_v51 }
 0x11f PF: > { %s14_s15 = sadd.s32 1, %s1335_s15  }
 0x120   : > { %p11_p4 = scmp.ge.s32.totalorder %s14_s15, 46  }
 0x122   :  { %13 = sbr.rel (!%p11_p4) target bundleno = 1 (0x1), region = 66 }

</bundles_post_ra>
